<compile_context>
chip_gen: v7x
topology: tpu7x:2x2x1
jax: 0.10.0
libtpu: 0.0.40
codegen_flags: <defaults>
</compile_context>

<pallas_src>
import functools
import math

import jax
import jax.numpy as jnp
from jax.experimental import pallas as pl
from jax.experimental.pallas import tpu as pltpu


def mha_kernel(*refs, num_heads, head_dim, has_kpm, has_mask):
    it = iter(refs)
    x_ref = next(it)                            # (1, L, D)    f32
    kpm_ref = next(it) if has_kpm else None     # (1, H, L, L) f32 additive
    mask_ref = next(it) if has_mask else None   # (1, H, L, L) f32 multiplicative
    w_qkv_ref = next(it)                        # (3D, D)      bf16, rows [q; k; v]
    b_qkv_ref = next(it)                        # (3D, 1)      f32
    w_out_ref = next(it)                        # (H, hd, D)   bf16 (= out_proj.weight.T per head)
    b_out_ref = next(it)                        # (1, D)       f32
    out_ref = next(it)                          # (1, L, D)    f32

    H, hd = num_heads, head_dim
    L = x_ref.shape[1]
    D = x_ref.shape[2]
    scaling = float(hd) ** -0.5

    x = x_ref[0].astype(jnp.bfloat16)           # (L, D)

    # Fused q/k/v projection, computed transposed: projT = W_qkv @ x^T -> (3D, L).
    projT = jax.lax.dot_general(
        w_qkv_ref[...], x,
        dimension_numbers=(((1,), (1,)), ((), ())),
        preferred_element_type=jnp.float32)
    projT = projT + b_qkv_ref[...]              # lane-broadcast bias, (3D, L) f32

    # Head split via major/sublane-chunk reshapes (no lane slicing).
    qT = projT[0 * D:1 * D].reshape(H, hd, L)   # (H, hd, L)
    kT = projT[1 * D:2 * D].reshape(H, hd, L)
    vT = projT[2 * D:3 * D].reshape(H, hd, L)

    q = jnp.swapaxes(qT, 1, 2) * scaling        # (H, L, hd), f32

    # Scores for all heads in one batched MXU stream: einsum('hqd,hdk->hqk').
    s = jax.lax.dot_general(
        q.astype(jnp.bfloat16), kT.astype(jnp.bfloat16),
        dimension_numbers=(((2,), (1,)), ((0,), (0,))),
        preferred_element_type=jnp.float32)     # (H, L, L)

    if has_kpm:
        s = s + kpm_ref[0]
    # TODO(synk): relative_bias=True gather path not wired (module default is False).

    if has_mask:
        w = jax.nn.sigmoid(s) * mask_ref[0]     # hoisted sigmoid on full (H, L, L) slab
    else:
        m = jnp.max(s, axis=-1, keepdims=True)
        e = jnp.exp(s - m)
        w = e * pl.reciprocal(jnp.sum(e, axis=-1, keepdims=True), approx=True)
    # self.drop(...) is identity in eval mode.

    # attn @ v for all heads: einsum('hqk,hdk->hqd') (contract over keys).
    o = jax.lax.dot_general(
        w.astype(jnp.bfloat16), vT.astype(jnp.bfloat16),
        dimension_numbers=(((2,), (2,)), ((0,), (0,))),
        preferred_element_type=jnp.float32)     # (H, L, hd)

    # Output projection folded per head then reduced over heads:
    # einsum('hqd,hdE->hqE') followed by sum over h (no lane-axis concat).
    ctrb = jax.lax.dot_general(
        o.astype(jnp.bfloat16), w_out_ref[...],
        dimension_numbers=(((2,), (1,)), ((0,), (0,))),
        preferred_element_type=jnp.float32)     # (H, L, D)
    out = jnp.sum(ctrb, axis=0) + b_out_ref[...]

    out_ref[0] = out.astype(out_ref.dtype)


def multihead_attention(query, params, *, num_heads,
                        key_padding_mask=None, attn_mask=None):
    """Pallas forward of MultiheadAttention.  query: (length, bsz, embed_dim)."""
    L, B, D = query.shape
    H = num_heads
    hd = D // H
    assert hd * H == D, "embed_dim must be divisible by num_heads"

    x = jnp.transpose(query, (1, 0, 2)).astype(jnp.float32)          # (B, L, D)

    w_qkv = jnp.concatenate(
        [params["w_q"], params["w_k"], params["w_v"]], axis=0).astype(jnp.bfloat16)
    b_qkv = jnp.concatenate(
        [params["b_q"], params["b_k"], params["b_v"]]).reshape(3 * D, 1).astype(jnp.float32)
    w_out_heads = params["w_out"].T.reshape(H, hd, D).astype(jnp.bfloat16)
    b_out_row = params["b_out"].reshape(1, D).astype(jnp.float32)

    has_kpm = key_padding_mask is not None
    has_mask = attn_mask is not None

    inputs = [x]
    in_specs = [pl.BlockSpec((1, L, D), lambda b: (b, 0, 0))]
    if has_kpm:
        kpm = jnp.broadcast_to(jnp.asarray(key_padding_mask, jnp.float32),
                               (B * H, L, L)).reshape(B, H, L, L)
        inputs.append(kpm)
        in_specs.append(pl.BlockSpec((1, H, L, L), lambda b: (b, 0, 0, 0)))
    if has_mask:
        am = jnp.broadcast_to(jnp.asarray(attn_mask, jnp.float32),
                              (B * H, L, L)).reshape(B, H, L, L)
        inputs.append(am)
        in_specs.append(pl.BlockSpec((1, H, L, L), lambda b: (b, 0, 0, 0)))
    inputs += [w_qkv, b_qkv, w_out_heads, b_out_row]
    in_specs += [
        pl.BlockSpec((3 * D, D), lambda b: (0, 0)),
        pl.BlockSpec((3 * D, 1), lambda b: (0, 0)),
        pl.BlockSpec((H, hd, D), lambda b: (0, 0, 0)),
        pl.BlockSpec((1, D), lambda b: (0, 0)),
    ]

    kernel = functools.partial(mha_kernel, num_heads=H, head_dim=hd,
                               has_kpm=has_kpm, has_mask=has_mask)

    flops = B * (8 * L * D * D + 4 * L * L * D)
    bytes_accessed = sum(int(a.size * a.dtype.itemsize) for a in inputs) + B * L * D * 4
    cost = pl.CostEstimate(flops=flops, transcendentals=B * H * L * L,
                           bytes_accessed=bytes_accessed)

    out = pl.pallas_call(
        kernel,
        out_shape=jax.ShapeDtypeStruct((B, L, D), jnp.float32),
        grid=(B,),
        in_specs=in_specs,
        out_specs=pl.BlockSpec((1, L, D), lambda b: (b, 0, 0)),
        compiler_params=pltpu.CompilerParams(
            dimension_semantics=("parallel",),
            vmem_limit_bytes=32 * 1024 * 1024),
        cost_estimate=cost,
    )(*inputs)

    return jnp.transpose(out, (1, 0, 2))                             # (L, B, D)


def reference_mha(query, params, num_heads, key_padding_mask=None,
                  attn_mask=None, dot_dtype=jnp.float32):
    """Pure-JAX mirror of the PyTorch forward (eval mode)."""
    L, B, D = query.shape
    H = num_heads
    hd = D // H
    scaling = float(hd) ** -0.5

    def linear(x2, w, b):
        y = jnp.dot(x2.astype(dot_dtype), w.T.astype(dot_dtype),
                    preferred_element_type=jnp.float32)
        return y + b

    x2 = query.reshape(L * B, D)
    q = (linear(x2, params["w_q"], params["b_q"]) * scaling).reshape(L, B * H, hd)
    k = linear(x2, params["w_k"], params["b_k"]).reshape(L, B * H, hd)
    v = linear(x2, params["w_v"], params["b_v"]).reshape(L, B * H, hd)
    q = jnp.transpose(q, (1, 0, 2))
    k = jnp.transpose(k, (1, 0, 2))
    v = jnp.transpose(v, (1, 0, 2))

    w = jnp.einsum('bik,bjk->bij', q.astype(dot_dtype), k.astype(dot_dtype),
                   preferred_element_type=jnp.float32)
    if key_padding_mask is not None:
        w = w + key_padding_mask
    if attn_mask is None:
        w = jax.nn.softmax(w, axis=-1)
    else:
        w = jax.nn.sigmoid(w) * attn_mask
    out = jnp.einsum('bij,bjd->bid', w.astype(dot_dtype), v.astype(dot_dtype),
                     preferred_element_type=jnp.float32)
    out = jnp.transpose(out, (1, 0, 2)).reshape(L * B, D)
    out = linear(out, params["w_out"], params["b_out"])
    return out.reshape(L, B, D)


def xavier_uniform(key, shape):
    fan_out, fan_in = shape
    limit = math.sqrt(6.0 / (fan_in + fan_out))
    return jax.random.uniform(key, shape, jnp.float32, -limit, limit)


if __name__ == "__main__":
    L, B = 8, 2
    embed_dim, num_heads = 32, 4

    key = jax.random.PRNGKey(0)
    ks = jax.random.split(key, 11)

    # PyTorch init uses xavier-uniform weights and zero biases; biases are
    # randomized (small) here so the bias handling is actually exercised.
    params = {
        "w_q": xavier_uniform(ks[0], (embed_dim, embed_dim)),
        "w_k": xavier_uniform(ks[1], (embed_dim, embed_dim)),
        "w_v": xavier_uniform(ks[2], (embed_dim, embed_dim)),
        "w_out": xavier_uniform(ks[3], (embed_dim, embed_dim)),
        "b_q": 0.1 * jax.random.normal(ks[4], (embed_dim,), jnp.float32),
        "b_k": 0.1 * jax.random.normal(ks[5], (embed_dim,), jnp.float32),
        "b_v": 0.1 * jax.random.normal(ks[6], (embed_dim,), jnp.float32),
        "b_out": 0.1 * jax.random.normal(ks[7], (embed_dim,), jnp.float32),
    }

    query = jax.random.normal(ks[8], (L, B, embed_dim), jnp.float32)
    # additive key-padding mask (0 = keep, -30 = drop), shape (bsz*H, L, L)
    keep = jax.random.bernoulli(ks[9], 0.9, (B * num_heads, L, L))
    key_padding_mask = jnp.where(keep, 0.0, -30.0).astype(jnp.float32)
    # multiplicative attention-rescaling mask in [0, 1], shape (bsz*H, L, L)
    attn_mask = jax.random.uniform(ks[10], (B * num_heads, L, L), jnp.float32)

    # Path 1: attn_mask given -> sigmoid(weights) * attn_mask
    out1 = multihead_attention(query, params, num_heads=num_heads,
                               key_padding_mask=key_padding_mask,
                               attn_mask=attn_mask)
    # Path 2: no masks -> softmax over keys
    out2 = multihead_attention(query, params, num_heads=num_heads)
    jax.block_until_ready((out1, out2))

    ref1_bf = reference_mha(query, params, num_heads, key_padding_mask,
                            attn_mask, dot_dtype=jnp.bfloat16)
    ref2_bf = reference_mha(query, params, num_heads, dot_dtype=jnp.bfloat16)
    ref1_f32 = reference_mha(query, params, num_heads, key_padding_mask, attn_mask)
    ref2_f32 = reference_mha(query, params, num_heads)

    assert out1.shape == (L, B, embed_dim) and out2.shape == (L, B, embed_dim)
    # tight check against a matmul-precision-matched (bf16-input) reference
    assert jnp.allclose(out1, ref1_bf, rtol=5e-3, atol=5e-3)
    assert jnp.allclose(out2, ref2_bf, rtol=5e-3, atol=5e-3)
    # loose sanity check against the full-f32 reference
    assert jnp.allclose(out1, ref1_f32, rtol=1e-1, atol=1e-1)
    assert jnp.allclose(out2, ref2_f32, rtol=1e-1, atol=1e-1)

    print("KERNEL_OK")
</pallas_src>

<mosaic_0001>
module attributes {stable_mosaic.version = 11 : i64} {
  func.func @mha_kernel(%arg0: i32, %arg1: memref<1x8x32xf32, #tpu.memory_space<vmem>>, %arg2: memref<1x4x8x8xf32, #tpu.memory_space<vmem>>, %arg3: memref<1x4x8x8xf32, #tpu.memory_space<vmem>>, %arg4: memref<96x32xbf16, #tpu.memory_space<vmem>>, %arg5: memref<96x1xf32, #tpu.memory_space<vmem>>, %arg6: memref<4x8x32xbf16, #tpu.memory_space<vmem>>, %arg7: memref<1x32xf32, #tpu.memory_space<vmem>>, %arg8: memref<1x8x32xf32, #tpu.memory_space<vmem>>) attributes {dimension_semantics = [#tpu.dimension_semantics<parallel>], iteration_bounds = array<i64: 2>, scalar_prefetch = 0 : i64, scratch_operands = 0 : i64, tpu.core_type = #tpu.core_type<tc>, window_params = [{transform_indices = @transform_0, window_bounds = array<i64: 1, 8, 32>}, {transform_indices = @transform_1, window_bounds = array<i64: 1, 4, 8, 8>}, {transform_indices = @transform_2, window_bounds = array<i64: 1, 4, 8, 8>}, {pipeline_mode = #tpu.pipeline_mode<synchronous>, transform_indices = @transform_3, window_bounds = array<i64: 96, 32>}, {pipeline_mode = #tpu.pipeline_mode<synchronous>, transform_indices = @transform_4, window_bounds = array<i64: 96, 1>}, {pipeline_mode = #tpu.pipeline_mode<synchronous>, transform_indices = @transform_5, window_bounds = array<i64: 4, 8, 32>}, {pipeline_mode = #tpu.pipeline_mode<synchronous>, transform_indices = @transform_6, window_bounds = array<i64: 1, 32>}, {transform_indices = @transform_7, window_bounds = array<i64: 1, 8, 32>}]} {
    %c0 = arith.constant 0 : index
    %c0_0 = arith.constant 0 : index
    %c0_1 = arith.constant 0 : index
    %0 = vector.load %arg1[%c0, %c0_0, %c0_1] : memref<1x8x32xf32, #tpu.memory_space<vmem>>, vector<1x8x32xf32>
    %1 = vector.shape_cast %0 : vector<1x8x32xf32> to vector<8x32xf32>
    %2 = arith.truncf %1 : vector<8x32xf32> to vector<8x32xbf16>
    %c0_2 = arith.constant 0 : index
    %c0_3 = arith.constant 0 : index
    %3 = vector.load %arg4[%c0_2, %c0_3] : memref<96x32xbf16, #tpu.memory_space<vmem>>, vector<96x32xbf16>
    %cst = arith.constant dense<0.000000e+00> : vector<96x8xf32>
    %4 = tpu.matmul %3, %2, %cst {dimension_numbers = #tpu.dot_dimension_numbers<[1], [1], [0], [0], [0, 0, 1, 0], [], []>} : vector<96x32xbf16>, vector<8x32xbf16>, vector<96x8xf32> -> vector<96x8xf32>
    %c0_4 = arith.constant 0 : index
    %c0_5 = arith.constant 0 : index
    %5 = vector.load %arg5[%c0_4, %c0_5] : memref<96x1xf32, #tpu.memory_space<vmem>>, vector<96x1xf32>
    %6 = vector.broadcast %5 : vector<96x1xf32> to vector<96x8xf32>
    %7 = arith.addf %4, %6 : vector<96x8xf32>
    %8 = vector.extract_strided_slice %7 {offsets = [0, 0], sizes = [32, 8], strides = [1, 1]} : vector<96x8xf32> to vector<32x8xf32>
    %9 = vector.shape_cast %8 : vector<32x8xf32> to vector<4x8x8xf32>
    %10 = vector.extract_strided_slice %7 {offsets = [32, 0], sizes = [32, 8], strides = [1, 1]} : vector<96x8xf32> to vector<32x8xf32>
    %11 = vector.shape_cast %10 : vector<32x8xf32> to vector<4x8x8xf32>
    %12 = vector.extract_strided_slice %7 {offsets = [64, 0], sizes = [32, 8], strides = [1, 1]} : vector<96x8xf32> to vector<32x8xf32>
    %13 = vector.shape_cast %12 : vector<32x8xf32> to vector<4x8x8xf32>
    %14 = tpu.transpose %9, [0, 2, 1] : vector<4x8x8xf32> -> vector<4x8x8xf32>
    %cst_6 = arith.constant 0.353553385 : f32
    %15 = vector.broadcast %cst_6 : f32 to vector<4x8x8xf32>
    %16 = arith.mulf %14, %15 : vector<4x8x8xf32>
    %17 = arith.truncf %16 : vector<4x8x8xf32> to vector<4x8x8xbf16>
    %18 = arith.truncf %11 : vector<4x8x8xf32> to vector<4x8x8xbf16>
    %cst_7 = arith.constant dense<0.000000e+00> : vector<4x8x8xf32>
    %19 = tpu.matmul %17, %18, %cst_7 {dimension_numbers = #tpu.dot_dimension_numbers<[2], [1], [1], [2], [0, 0, 0, 1, 1, 2], [0], [0]>} : vector<4x8x8xbf16>, vector<4x8x8xbf16>, vector<4x8x8xf32> -> vector<4x8x8xf32>
    %c0_8 = arith.constant 0 : index
    %c0_9 = arith.constant 0 : index
    %c0_10 = arith.constant 0 : index
    %c0_11 = arith.constant 0 : index
    %20 = vector.load %arg2[%c0_8, %c0_9, %c0_10, %c0_11] : memref<1x4x8x8xf32, #tpu.memory_space<vmem>>, vector<1x4x8x8xf32>
    %21 = vector.shape_cast %20 : vector<1x4x8x8xf32> to vector<4x8x8xf32>
    %22 = arith.addf %19, %21 : vector<4x8x8xf32>
    %23 = arith.negf %22 : vector<4x8x8xf32>
    %24 = math.exp %23 : vector<4x8x8xf32>
    %cst_12 = arith.constant 1.000000e+00 : f32
    %25 = vector.broadcast %cst_12 : f32 to vector<4x8x8xf32>
    %26 = arith.addf %25, %24 : vector<4x8x8xf32>
    %27 = arith.divf %25, %26 : vector<4x8x8xf32>
    %c0_13 = arith.constant 0 : index
    %c0_14 = arith.constant 0 : index
    %c0_15 = arith.constant 0 : index
    %c0_16 = arith.constant 0 : index
    %28 = vector.load %arg3[%c0_13, %c0_14, %c0_15, %c0_16] : memref<1x4x8x8xf32, #tpu.memory_space<vmem>>, vector<1x4x8x8xf32>
    %29 = vector.shape_cast %28 : vector<1x4x8x8xf32> to vector<4x8x8xf32>
    %30 = arith.mulf %27, %29 : vector<4x8x8xf32>
    %31 = arith.truncf %30 : vector<4x8x8xf32> to vector<4x8x8xbf16>
    %32 = arith.truncf %13 : vector<4x8x8xf32> to vector<4x8x8xbf16>
    %cst_17 = arith.constant dense<0.000000e+00> : vector<4x8x8xf32>
    %33 = tpu.matmul %31, %32, %cst_17 {dimension_numbers = #tpu.dot_dimension_numbers<[2], [2], [1], [1], [0, 0, 0, 1, 1, 1], [0], [0]>} : vector<4x8x8xbf16>, vector<4x8x8xbf16>, vector<4x8x8xf32> -> vector<4x8x8xf32>
    %34 = arith.truncf %33 : vector<4x8x8xf32> to vector<4x8x8xbf16>
    %c0_18 = arith.constant 0 : index
    %c0_19 = arith.constant 0 : index
    %c0_20 = arith.constant 0 : index
    %35 = vector.load %arg6[%c0_18, %c0_19, %c0_20] : memref<4x8x32xbf16, #tpu.memory_space<vmem>>, vector<4x8x32xbf16>
    %cst_21 = arith.constant dense<0.000000e+00> : vector<4x8x32xf32>
    %36 = tpu.matmul %34, %35, %cst_21 {dimension_numbers = #tpu.dot_dimension_numbers<[2], [1], [1], [2], [0, 0, 0, 1, 1, 2], [0], [0]>} : vector<4x8x8xbf16>, vector<4x8x32xbf16>, vector<4x8x32xf32> -> vector<4x8x32xf32>
    %cst_22 = arith.constant dense<0.000000e+00> : vector<8x32xf32>
    %37 = vector.multi_reduction <add>, %36, %cst_22 [0] : vector<4x8x32xf32> to vector<8x32xf32>
    %c0_23 = arith.constant 0 : index
    %c0_24 = arith.constant 0 : index
    %38 = vector.load %arg7[%c0_23, %c0_24] : memref<1x32xf32, #tpu.memory_space<vmem>>, vector<1x32xf32>
    %39 = vector.broadcast %38 : vector<1x32xf32> to vector<8x32xf32>
    %40 = arith.addf %37, %39 : vector<8x32xf32>
    %c0_25 = arith.constant 0 : index
    %c0_26 = arith.constant 0 : index
    %c0_27 = arith.constant 0 : index
    %41 = vector.load %arg8[%c0_25, %c0_26, %c0_27] : memref<1x8x32xf32, #tpu.memory_space<vmem>>, vector<1x8x32xf32>
    %42 = vector.shape_cast %41 : vector<1x8x32xf32> to vector<8x32xf32>
    %43 = vector.shape_cast %40 : vector<8x32xf32> to vector<1x8x32xf32>
    tpu.vector_store %arg8[%c0_25, %c0_26, %c0_27], %43 {strides = array<i32>} : memref<1x8x32xf32, #tpu.memory_space<vmem>>, vector<1x8x32xf32>,
    return
  }
  func.func @transform_0(%arg0: i32) -> (i32, i32, i32) {
    %c0_i32 = arith.constant 0 : i32
    %c0_i32_0 = arith.constant 0 : i32
    %c0_i32_1 = arith.constant 0 : i32
    return %arg0, %c0_i32, %c0_i32_0 : i32, i32, i32
  }
  func.func @transform_1(%arg0: i32) -> (i32, i32, i32, i32) {
    %c0_i32 = arith.constant 0 : i32
    %c0_i32_0 = arith.constant 0 : i32
    %c0_i32_1 = arith.constant 0 : i32
    %c0_i32_2 = arith.constant 0 : i32
    return %arg0, %c0_i32, %c0_i32_0, %c0_i32_1 : i32, i32, i32, i32
  }
  func.func @transform_2(%arg0: i32) -> (i32, i32, i32, i32) {
    %c0_i32 = arith.constant 0 : i32
    %c0_i32_0 = arith.constant 0 : i32
    %c0_i32_1 = arith.constant 0 : i32
    %c0_i32_2 = arith.constant 0 : i32
    return %arg0, %c0_i32, %c0_i32_0, %c0_i32_1 : i32, i32, i32, i32
  }
  func.func @transform_3(%arg0: i32) -> (i32, i32) {
    %c0_i32 = arith.constant 0 : i32
    %c0_i32_0 = arith.constant 0 : i32
    %c0_i32_1 = arith.constant 0 : i32
    return %c0_i32, %c0_i32_0 : i32, i32
  }
  func.func @transform_4(%arg0: i32) -> (i32, i32) {
    %c0_i32 = arith.constant 0 : i32
    %c0_i32_0 = arith.constant 0 : i32
    %c0_i32_1 = arith.constant 0 : i32
    return %c0_i32, %c0_i32_0 : i32, i32
  }
  func.func @transform_5(%arg0: i32) -> (i32, i32, i32) {
    %c0_i32 = arith.constant 0 : i32
    %c0_i32_0 = arith.constant 0 : i32
    %c0_i32_1 = arith.constant 0 : i32
    %c0_i32_2 = arith.constant 0 : i32
    return %c0_i32, %c0_i32_0, %c0_i32_1 : i32, i32, i32
  }
  func.func @transform_6(%arg0: i32) -> (i32, i32) {
    %c0_i32 = arith.constant 0 : i32
    %c0_i32_0 = arith.constant 0 : i32
    %c0_i32_1 = arith.constant 0 : i32
    return %c0_i32, %c0_i32_0 : i32, i32
  }
  func.func @transform_7(%arg0: i32) -> (i32, i32, i32) {
    %c0_i32 = arith.constant 0 : i32
    %c0_i32_0 = arith.constant 0 : i32
    %c0_i32_1 = arith.constant 0 : i32
    return %arg0, %c0_i32, %c0_i32_0 : i32, i32, i32
  }
}

</mosaic_0001>

<bundles_post_ra>
// kernel: tpu_custom_call.1
= control target key start
LH: loop header
LB: loop body
LE: loop exit
PB: predicated region body
PF: predicated region fallthrough
CT: control target
= control target key end

     0   :  { %12 = vsyncpa [#allocation3], 0  ;;  %s1998_s0 = inlined_call_operand.vmem [shape: f32[2,8,32], index: 0, kind: input, shape index: {}]   ;;  %s1999_s1 = inlined_call_operand.vmem [shape: f32[2,4,8,8], index: 1, kind: input, shape index: {}]   ;;  %s2000_s2 = inlined_call_operand.vmem [shape: f32[2,4,8,8], index: 2, kind: input, shape index: {}]   ;;  %s2001_s3 = inlined_call_operand.vmem [shape: bf16[96,32], index: 3, kind: input, shape index: {}]   ;;  %s2002_s4 = inlined_call_operand.vmem [shape: f32[96,1], index: 4, kind: input, shape index: {}]   ;;  %s2003_s5 = inlined_call_operand.vmem [shape: bf16[4,8,32], index: 5, kind: input, shape index: {}]   ;;  %s2004_s6 = inlined_call_operand.vmem [shape: f32[1,32], index: 6, kind: input, shape index: {}]   ;;  %s2005_s7 = inlined_call_operand.hbm [shape: f32[2,8,32], index: 7, kind: output, shape index: {}]  }
   0x1   :  { %14 = vsyncpa [#allocation3 + $0x1], 0  ;;  %s1730_s24 = smov 0   ;;  %s1732_s25 = smov 0  }
   0x2   :  { %s1734_s26 = smov 0   ;;  %s1736_s27 = smov 0  }
   0x3 LB: > { %s1751_s28 = sadd.s32 4294967295, %s1684_s27   ;;  %s1393_s29 = sadd.s32 4294967294, %s1684_s27   ;;  %s1684_s27 = sphi %s1736_s27, %s2011_s27   ;;  %s1680_s26 = sphi %s1734_s26, %s2010_s26   ;;  %s1676_s25 = sphi %s1732_s25, %s2009_s25   ;;  %s1672_s24 = sphi %s1730_s24, %s2008_s24  }
   0x4   : > { %s1755_s30 = sadd.s32 1, %s1684_s27   ;;  %s189_s8 = sadd.s32 1, %s1680_s26 }
   0x5   : > { %s186_s9 = ssub.s32 %s1684_s27, %s1755_s30  ;;  %p199_p0 = scmp.ne.s32.totalorder %s1680_s26, %s1676_s25 }
   0x6   : > { %p187_p1 = scmp.eq.s32.totalorder %s186_s9, 0  ;;  %p200_p2 = scmp.eq.s32.totalorder %s1751_s28, 1 }
   0x7   : > { %p205_p3 = scmp.ne.s32.totalorder %s1676_s25, %s1672_s24  ;;  %p206_p4 = scmp.eq.s32.totalorder %s1393_s29, 1 }
   0x8   : > { %s1766_s10 = scalar_select %p187_p1, %s1680_s26, %s189_s8  }
   0x9   : > { %p1768_p5 = por %p200_p2, %p199_p0  ;;  %p1772_p6 = por %p206_p4, %p205_p3 }
   0xa   : > { %p1396_p7 = scmp.ge.s32.totalorder %s1684_s27, 1  ;;  %p259_p8 = scmp.lt.s32.totalorder %s1684_s27, 3 }
   0xc   : > { %p260_p9 = pnand %p1396_p7, %p259_p8 }
   0xd   : > { %p300_p10 = scmp.lt.s32.totalorder (!%p260_p9), %s1751_s28, 1  ;;  %v1600_v0 = vld [vmem:[%s2001_s3] sm:$0xff] (!%p260_p9)   ;;  %vm431_vm0 = vcmask (!%p260_p9), 261120   ;;  %v1686_v1 = vmov (!%p260_p9), 0   ;;  %v331_v3 = vld [vmem:[%s2002_s4 + $0x10] sm:$0xff] (!%p260_p9)  ;;  %v330_v5 = vld [vmem:[%s2002_s4 + $0x8] sm:$0xff] (!%p260_p9) }
   0xe   : > { %263 = sbr.rel (%p260_p9) target bundleno = 1097 (0x449), region = 48  ;;  %1598 = vset.pattern.permute.xlu0 (!%p260_p9), %v1686_v1  ;;  %1599 = vset.pattern.permute.xlu1 (!%p260_p9), %v1686_v1  ;;  %v329_v2 = vld [vmem:[%s2002_s4] sm:$0xff] (!%p260_p9)  ;;  %v332_v7 = vld [vmem:[%s2002_s4 + $0x18] sm:$0xff] (!%p260_p9)  ;;  %v334_v10 = vld [vmem:[%s2002_s4 + $0x28] sm:$0xff] (!%p260_p9)  ;;  %v1687_v18 = vmov (!%p260_p9), 0.0   ;;  %vm1688_vm1 = vmmov (!%p260_p9), 0  }
   0xf   : > { %1471 = vmatprep.mubr.msk.bf16.mxu0 (!%p260_p9), %vm431_vm0, %v1600_v0  ;;  %343 = vperm.xlu0 (!%p260_p9), %1598, %v329_v2   ;;  %v333_v9 = vld [vmem:[%s2002_s4 + $0x20] sm:$0xff] (!%p260_p9)  ;;  %v1601_v11 = vld [vmem:[%s2001_s3 + $0x8] sm:$0xff] (!%p260_p9)   ;;  %v1602_v12 = vld [vmem:[%s2001_s3 + $0x10] sm:$0xff] (!%p260_p9)   ;;  %vm682_vm2 = vcmask (!%p260_p9), 1043456   ;;  %vm678_vm3 = vcmask (!%p260_p9), 64512   ;;  %s1433_s20 = sshll.u32 (!%p260_p9), %s1751_s28, 7 }
  0x10   : > { %353 = vperm.xlu1 (!%p260_p9), %1599, %v331_v3   ;;  %v335_v13 = vld [vmem:[%s2002_s4 + $0x30] sm:$0xff] (!%p260_p9)  ;;  %v336_v14 = vld [vmem:[%s2002_s4 + $0x38] sm:$0xff] (!%p260_p9)  ;;  %v1604_v16 = vld [vmem:[%s2001_s3 + $0x20] sm:$0xff] (!%p260_p9)   ;;  %1483 = vmatprep.subr.bf16.mxu1 (!%p260_p9), %v1687_v18  ;;  %s1955_s29 = scalar_lea.hbm (!%p260_p9), %s2005_s7, %s1433_s20  ;;  %s1689_s9 = smov (!%p260_p9), [#allocation2]  }
  0x11   : > { %v1603_v15 = vld [vmem:[%s2001_s3 + $0x18] sm:$0xff] (!%p260_p9)   ;;  %v1605_v17 = vld [vmem:[%s2001_s3 + $0x28] sm:$0xff] (!%p260_p9)   ;;  %1485 = vmatprep.mubr.msk.bf16.mxu1 (!%p260_p9), %vm1688_vm1, %v1687_v18  ;;  %v339_v44 = vld [vmem:[%s2002_s4 + $0x50] sm:$0xff] (!%p260_p9)  ;;  %s1626_s13 = sshll.u32 (!%p260_p9), %s1689_s9, 4  ;;  %s1627_s13 = int_to_ptr.vmem [resolvable:$false] %s1626_s13 }
  0x12   : > { %v338_v41 = vld [vmem:[%s2002_s4 + $0x48] sm:$0xff] (!%p260_p9)  ;;  %v340_v45 = vld [vmem:[%s2002_s4 + $0x58] sm:$0xff] (!%p260_p9)  ;;  %v337_v46 = vld [vmem:[%s2002_s4 + $0x40] sm:$0xff] (!%p260_p9) }
  0x13   : > { %348 = vperm.xlu0 (!%p260_p9), %1598, %v330_v5  }
  0x14   : > { %358 = vperm.xlu1 (!%p260_p9), %1599, %v332_v7  }
  0x15   : > { %s1783_s15 = scalar_select %p300_p10, %s1751_s28, 1 }
  0x17   : > { %s1398_s16 = sshll.u32 %s1783_s15, 3  ;;  %363 = vperm.xlu0 %1598, %v333_v9   ;;  %s1436_s14 = sshll.u32 %s1783_s15, 5 }
  0x18   : > { %s303_s21 = scalar_lea.vmem %s1998_s0, %s1398_s16  ;;  %368 = vperm.xlu1 %1599, %v334_v10   ;;  %s308_s18 = scalar_lea.vmem %s1999_s1, %s1436_s14 }
  0x19   : > { %v315_v4 = vld [vmem:[%s303_s21] sm:$0xff]  ;;  %s1893_s21 = scalar_lea.vmem %s2000_s2, %s1436_s14  ;;  %s297_s16 = sand.u32 1, %s1676_s25  }
  0x1a   : > { %v316_v6 = vpack.c.bf16 %v315_v4, %v315_v4  ;;  %s1397_s17 = sshll.u32 %s297_s16, 3  ;;  %s1297_s8 = scalar_lea.sflag [#allocation3], %s297_s16 }
  0x1b   : > { %373 = vperm.xlu0 %1598, %v335_v13   ;;  %s1628_s14 = scalar_lea.vmem %s1627_s13, 256 }
  0x1c   : > { %1555 = vmatprep.subr.msk.bf16.mxu0 %vm431_vm0, %v316_v6  ;;  %v451_v8 = vsel %vm431_vm0, %v316_v6, 0  ;;  %378 = vperm.xlu1 %1599, %v336_v14  }
  0x1d   : > { %1470 = vmatpush3.bf16.xpose.msra.mxu0 %v451_v8 }
  0x1e   : > { %1507 = vmatprep.subr.bf16.mxu0 %v1687_v18 }
  0x24   : > { %1472 = vmatmul.mubr.msk.bf16.vlgmr.msra.gmra.mrb[0].mxu0 %vm431_vm0, %v1601_v11 }
  0x25   : > { %1475 = vmatprep.mubr.msk.bf16.mxu0 %vm431_vm0, %v1602_v12 }
  0x2c   : > { %1476 = vmatmul.mubr.msk.bf16.gmra.mrb[4].mxu0 %vm431_vm0, %v1603_v15  ;;  %v674_v15 = vld [vmem:[%s308_s18] sm:$0xff] }
  0x2d   : > { %1479 = vmatprep.mubr.msk.bf16.mxu0 %vm431_vm0, %v1604_v16 }
  0x34   : > { %1480 = vmatmul.mubr.msk.bf16.gmra.mrb[8].mxu0 %vm431_vm0, %v1605_v17 }
  0x35   : > { %1509 = vmatprep.mubr.msk.bf16.mxu0 %vm1688_vm1, %v1687_v18 }
  0x8e   : > { %v344_v19 = vpop.permute.xlu0 %343 }
  0x8f   : > { %v354_v21 = vpop.permute.xlu1 %353 }
  0x92   : > { %v349_v25 = vpop.permute.xlu0 %348 }
  0x93   : > { %v359_v29 = vpop.permute.xlu1 %358 }
  0x96   : > { %v364_v31 = vpop.permute.xlu0 %363 }
  0x97   : > { %v369_v47 = vpop.permute.xlu1 %368 }
  0x9a   : > { %v374_v48 = vpop.permute.xlu0 %373 }
  0x9b   : > { %v379_v50 = vpop.permute.xlu1 %378 }
  0xf7   : > { %v1473_v20 = vpop.f32.mrb[0].mxu0 }
  0xf8   : > { %v487_v22 = vpop.f32.mrb[1].mxu0  ;;  %v496_v28 = vadd.f32 %v1473_v20, %v354_v21 }
  0xf9   : > { %v488_v23 = vadd.f32 %v487_v22, %v344_v19  ;;  %v1474_v24 = vpop.f32.mrb[2].mxu0 }
  0xfa   : > { %v490_v26 = vpop.f32.mrb[3].mxu0  ;;  %v499_v33 = vadd.f32 %v1474_v24, %v359_v29 }
  0xfb   : > { %v491_v27 = vadd.f32 %v490_v26, %v349_v25  ;;  %534 = vxpose.xlu0.b32.start.end [1/1] (short) (narrow) %v488_v23, 8  ;;  %v675_v23 = vld [vmem:[%s308_s18 + $0x8] sm:$0xff] }
  0xfd   : > { %566 = vxpose.xlu1.b32.start.end [1/1] (short) (narrow) %v491_v27, 8 }
  0xff   : > { %v1477_v30 = vpop.f32.mrb[4].mxu0  ;;  %598 = vxpose.xlu0.b32.start.end [1/1] (short) (narrow) %v496_v28, 8 }
 0x100   : > { %v503_v32 = vpop.f32.mrb[5].mxu0  ;;  %v512_v56 = vadd.f32 %v1477_v30, %v374_v48  ;;  %v676_v30 = vld [vmem:[%s308_s18 + $0x10] sm:$0xff] }
 0x101   : > { %v504_v34 = vadd.f32 %v503_v32, %v364_v31  ;;  %v1478_v35 = vpop.f32.mrb[6].mxu0 }
 0x102   : > { %v506_v36 = vpop.f32.mrb[7].mxu0  ;;  %v672_v59 = vpack.c.bf16 %v512_v56, %v512_v56  ;;  %v515_v63 = vadd.f32 %v1478_v35, %v379_v50 }
 0x103   : > { %v670_v37 = vpack.c.bf16 %v504_v34, %v504_v34  ;;  %630 = vxpose.xlu0.b32.start.end [1/1] (short) (narrow) %v499_v33, 8  ;;  %v507_v49 = vadd.f32 %v506_v36, %v369_v47 }
 0x104   : > { %v776_v62 = vsel %vm682_vm2, %v672_v59, 0  ;;  %v673_v1 = vpack.c.bf16 %v515_v63, %v515_v63 }
 0x105   : > { %v684_v38 = vsel %vm682_vm2, %v670_v37, 0  ;;  %v671_v52 = vpack.c.bf16 %v507_v49, %v507_v49  ;;  %v888_v49 = vld [vmem:[%s1893_s21] sm:$0xff] }
 0x106   : > { %1484 = vmatpush3.bf16.msra.mxu1 %v684_v38  ;;  %v822_v4 = vsel %vm682_vm2, %v673_v1, 0 }
 0x107   : > { %1489 = vmatprep.subr.bf16.mxu1 %v1687_v18  ;;  %v1844_v39 = vpop.f32.mrb[8].mxu0  ;;  %v730_v57 = vsel %vm682_vm2, %v671_v52, 0 }
 0x108   : > { %v519_v40 = vpop.f32.mrb[9].mxu0 }
 0x109   : > { %v1849_v42 = vpop.f32.mrb[10].mxu0 }
 0x10a   : > { %v522_v43 = vpop.f32.mrb[11].mxu0 }
 0x11b   : > { %388 = vperm.xlu1 %1599, %v338_v41   ;;  %v677_v41 = vld [vmem:[%s308_s18 + $0x18] sm:$0xff] }
 0x11f   : > { %393 = vperm.xlu1 %1599, %v339_v44  }
 0x123   : > { %398 = vperm.xlu1 %1599, %v340_v45  }
 0x12c   : > { %383 = vperm.xlu0 %1598, %v337_v46  }
 0x17b   : > { %v550_v51 = vpop.trf.xlu0 }
 0x17c   : > { %v662_v53 = vmul.f32 0.35355338, %v550_v51 }
 0x17d   : > { %v582_v54 = vpop.trf.xlu1 }
 0x17e   : > { %v666_v55 = vpack.c.bf16 %v662_v53, %v662_v53  ;;  %v663_v58 = vmul.f32 0.35355338, %v582_v54 }
 0x17f   : > { %v614_v61 = vpop.trf.xlu0 }
 0x180   : > { %1486 = vmatmul.mubr.msk.bf16.vlgmr.msra.gmra.mrb[0].mxu1 %vm678_vm3, %v666_v55  ;;  %v667_v60 = vpack.c.bf16 %v663_v58, %v663_v58  ;;  %v664_v0 = vmul.f32 0.35355338, %v614_v61  ;;  %v889_v61 = vld [vmem:[%s1893_s21 + $0x8] sm:$0xff] }
 0x181   : > { %1490 = vmatpush3.bf16.msra.mxu1 %v730_v57  ;;  %1491 = vmatprep.mubr.msk.bf16.mxu1 %vm1688_vm1, %v1687_v18 }
 0x182   : > { %1495 = vmatprep.subr.bf16.mxu1 %v1687_v18  ;;  %v668_v2 = vpack.c.bf16 %v664_v0, %v664_v0 }
 0x183   : > { %v646_v3 = vpop.trf.xlu0 }
 0x184   : > { %v665_v5 = vmul.f32 0.35355338, %v646_v3 }
 0x186   : > { %v669_v6 = vpack.c.bf16 %v665_v5, %v665_v5 }
 0x188   : > { %1492 = vmatmul.mubr.msk.bf16.vlgmr.msra.gmra.mrb[4].mxu1 %vm678_vm3, %v667_v60 }
 0x189   : > { %1496 = vmatpush3.bf16.msra.mxu1 %v776_v62  ;;  %1497 = vmatprep.mubr.msk.bf16.mxu1 %vm1688_vm1, %v1687_v18 }
 0x18a   : > { %1501 = vmatprep.subr.bf16.mxu1 %v1687_v18 }
 0x190   : > { %1498 = vmatmul.mubr.msk.bf16.vlgmr.msra.gmra.mrb[8].mxu1 %vm678_vm3, %v668_v2 }
 0x191   : > { %1502 = vmatpush3.bf16.msra.mxu1 %v822_v4  ;;  %1503 = vmatprep.mubr.msk.bf16.mxu1 %vm1688_vm1, %v1687_v18 }
 0x192   : > { %1513 = vmatprep.subr.bf16.mxu1 %v1687_v18 }
 0x198   : > { %1504 = vmatmul.mubr.msk.bf16.vlgmr.msra.gmra.mrb[12].mxu1 %vm678_vm3, %v669_v6 }
 0x199   : > { %1515 = vmatprep.mubr.msk.bf16.mxu1 %vm1688_vm1, %v1687_v18 }
 0x19a   : > { %v389_v7 = vpop.permute.xlu1 %388 }
 0x19b   : > { %v523_v8 = vadd.f32 %v522_v43, %v389_v7 }
 0x19d   : > { %v901_v9 = vpack.c.bf16 %v523_v8, %v523_v8  ;;  %v891_v8 = vld [vmem:[%s1893_s21 + $0x18] sm:$0xff] }
 0x19f   : > { %v954_v10 = vsel %vm678_vm3, %v901_v9, 0 }
 0x1a0   : > { %1514 = vmatpush3.bf16.xpose.msra.mxu1 %v954_v10 }
 0x1a1   : > { %1525 = vmatprep.subr.bf16.mxu1 %v1687_v18 }
 0x1ab   : > { %v384_v11 = vpop.permute.xlu0 %383 }
 0x1ac   : > { %v520_v12 = vadd.f32 %v519_v40, %v384_v11  ;;  %v394_v40 = vpop.permute.xlu1 %393 }
 0x1ad   : > { %v528_v46 = vadd.f32 %v1844_v39, %v394_v40 }
 0x1ae   : > { %v900_v13 = vpack.c.bf16 %v520_v12, %v520_v12  ;;  %v1092_v12 = vld [vmem:[%s2003_s5] sm:$0xf] }
 0x1af   : > { %v902_v54 = vpack.c.bf16 %v528_v46, %v528_v46 }
 0x1b0   : > { %v908_v14 = vsel %vm678_vm3, %v900_v13, 0  ;;  %v399_v56 = vpop.permute.xlu1 %398  ;;  %v1100_v13 = vsel %vm682_vm2, %v1092_v12, 0 }
 0x1b1   : > { %1508 = vmatpush3.bf16.xpose.msra.mxu0 %v908_v14  ;;  %v1000_v60 = vsel %vm678_vm3, %v902_v54, 0  ;;  %v531_v39 = vadd.f32 %v1849_v42, %v399_v56  ;;  %v890_v42 = vld [vmem:[%s1893_s21 + $0x10] sm:$0xff]  ;;  %v1093_v14 = vld [vmem:[%s2003_s5 + $0x4] sm:$0xf]  ;;  %s299_s21 = scalar_lea.vmem [#allocation2], %s1397_s17 }
 0x1b2   : > { %1519 = vmatprep.subr.bf16.mxu0 %v1687_v18  ;;  %s1310_s15 = sshll.u32 %s299_s21, 4  ;;  %s1957_s15 = int_to_ptr.vmem [resolvable:$true] %s1310_s15 }
 0x1b3   : > { %v903_v63 = vpack.c.bf16 %v531_v39, %v531_v39  ;;  %v1431_v39 = vld [vmem:[%s2004_s6] ss:$0 sm:$0xff]  ;;  %s1622_s28 = scalar_lea.vmem %s1957_s15, 128  ;;  %p1629_p0 = scmp.lt.s32.totalorder %s1957_s15, %s1627_s13 }
 0x1b4   : > { %p1623_p11 = scmp.ne.s32.totalorder %s1957_s15, %s1622_s28  ;;  %p1630_p1 = scmp.lt.s32.totalorder %s1628_s14, %s1622_s28 }
 0x1b5   : > { %v1046_v4 = vsel %vm678_vm3, %v903_v63, 0 }
 0x1b6   : > { %p1624_p12 = pnand %p1623_p11, %p1768_p5  ;;  %p1631_p2 = por %p1630_p1, %p1629_p0 }
 0x1b8   : > { %p1625_p13 = pneg %p1624_p12 }
 0x1ba   : > { %p1632_p3 = pnand %p1631_p2, %p1625_p13 }
 0x253   : > { %v720_v16 = vpop.f32.mrb[0].mxu1 }
 0x254   : > { %v721_v17 = vadd.f32 %v720_v16, %v674_v15  ;;  %v1487_v19 = vpop.f32.mrb[1].mxu1  ;;  %v1146_v15 = vsel %vm682_vm2, %v1093_v14, 0  ;;  %v1094_v16 = vld [vmem:[%s2003_s5 + $0x8] sm:$0xf] }
 0x255   : > { %v723_v20 = vpop.f32.mrb[2].mxu1 }
 0x256   : > { %v1419_v21 = vmul.f32 -1.442695, %v721_v17  ;;  %v1488_v22 = vpop.f32.mrb[3].mxu1 }
 0x258   : > { %1606 = vpow2.f32 %v1419_v21  ;;  %v1192_v21 = vsel %vm682_vm2, %v1094_v16, 0 }
 0x25b   : > { %v766_v24 = vpop.f32.mrb[4].mxu1 }
 0x25c   : > { %v767_v25 = vadd.f32 %v766_v24, %v675_v23  ;;  %v1493_v26 = vpop.f32.mrb[5].mxu1  ;;  %v1095_v24 = vld [vmem:[%s2003_s5 + $0xc] sm:$0xf] }
 0x25d   : > { %v769_v27 = vpop.f32.mrb[6].mxu1 }
 0x25e   : > { %v1420_v28 = vmul.f32 -1.442695, %v767_v25  ;;  %v1494_v29 = vpop.f32.mrb[7].mxu1 }
 0x260   : > { %1608 = vpow2.f32 %v1420_v28  ;;  %v1238_v28 = vsel %vm682_vm2, %v1095_v24, 0 }
 0x262   : > { %v1607_v31 = vpop.eup %1606 }
 0x263   : > { %v876_v32 = vadd.f32 1.0, %v1607_v31  ;;  %v812_v33 = vpop.f32.mrb[8].mxu1 }
 0x264   : > { %v813_v34 = vadd.f32 %v812_v33, %v676_v30  ;;  %v1499_v35 = vpop.f32.mrb[9].mxu1 }
 0x265   : > { %1610 = vrcp.f32 %v876_v32  ;;  %v815_v36 = vpop.f32.mrb[10].mxu1 }
 0x266   : > { %v1421_v37 = vmul.f32 -1.442695, %v813_v34  ;;  %v1500_v38 = vpop.f32.mrb[11].mxu1 }
 0x268   : > { %1612 = vpow2.f32 %v1421_v37 }
 0x26a   : > { %v1609_v43 = vpop.eup %1608 }
 0x26b   : > { %v877_v44 = vadd.f32 1.0, %v1609_v43  ;;  %v858_v45 = vpop.f32.mrb[12].mxu1 }
 0x26c   : > { %v859_v47 = vadd.f32 %v858_v45, %v677_v41  ;;  %v1505_v48 = vpop.f32.mrb[13].mxu1 }
 0x26d   : > { %1614 = vrcp.f32 %v877_v44  ;;  %v861_v50 = vpop.f32.mrb[14].mxu1 }
 0x26e   : > { %v1422_v51 = vmul.f32 -1.442695, %v859_v47  ;;  %v1506_v52 = vpop.f32.mrb[15].mxu1 }
 0x26f   : > { %v1611_v53 = vpop.eup %1610 }
 0x270   : > { %v892_v55 = vmul.f32 %v1611_v53, %v888_v49  ;;  %1616 = vpow2.f32 %v1422_v51 }
 0x272   : > { %v1613_v57 = vpop.eup %1612  ;;  %v896_v58 = vpack.c.bf16 %v892_v55, %v892_v55 }
 0x273   : > { %v878_v59 = vadd.f32 1.0, %v1613_v57 }
 0x274   : > { %1510 = vmatmul.mubr.msk.bf16.vlgmr.msra.gmra.mrb[12].mxu0 %vm678_vm3, %v896_v58 }
 0x275   : > { %1618 = vrcp.f32 %v878_v59  ;;  %1520 = vmatpush3.bf16.xpose.msra.mxu0 %v1000_v60  ;;  %1521 = vmatprep.mubr.msk.bf16.mxu0 %vm1688_vm1, %v1687_v18 }
 0x276   : > { %1531 = vmatprep.subr.bf16.mxu0 %v1687_v18 }
 0x277   : > { %v1615_v62 = vpop.eup %1614 }
 0x278   : > { %v893_v0 = vmul.f32 %v1615_v62, %v889_v61 }
 0x27a   : > { %v1617_v1 = vpop.eup %1616  ;;  %v897_v2 = vpack.c.bf16 %v893_v0, %v893_v0 }
 0x27b   : > { %v879_v3 = vadd.f32 1.0, %v1617_v1 }
 0x27c   : > { %1516 = vmatmul.mubr.msk.bf16.vlgmr.msra.gmra.mrb[16].mxu1 %vm678_vm3, %v897_v2 }
 0x27d   : > { %1620 = vrcp.f32 %v879_v3  ;;  %1526 = vmatpush3.bf16.xpose.msra.mxu1 %v1046_v4  ;;  %1527 = vmatprep.mubr.msk.bf16.mxu1 %vm1688_vm1, %v1687_v18 }
 0x27e   : > { %1537 = vmatprep.subr.bf16.mxu1 %v1687_v18 }
 0x27f   : > { %v1619_v5 = vpop.eup %1618 }
 0x280   : > { %v894_v6 = vmul.f32 %v1619_v5, %v890_v42 }
 0x282   : > { %v898_v7 = vpack.c.bf16 %v894_v6, %v894_v6 }
 0x284   : > { %1522 = vmatmul.mubr.msk.bf16.vlgmr.msra.gmra.mrb[16].mxu0 %vm678_vm3, %v898_v7 }
 0x285   : > { %1533 = vmatprep.mubr.msk.bf16.mxu0 %vm1688_vm1, %v1687_v18  ;;  %1532 = vmatpush3.bf16.msra.mxu0 %v1100_v13 }
 0x286   : > { %1543 = vmatprep.subr.bf16.mxu0 %v1687_v18 }
 0x287   : > { %v1621_v9 = vpop.eup %1620 }
 0x288   : > { %v895_v10 = vmul.f32 %v1621_v9, %v891_v8 }
 0x28a   : > { %v899_v11 = vpack.c.bf16 %v895_v10, %v895_v10 }
 0x28c   : > { %1528 = vmatmul.mubr.msk.bf16.vlgmr.msra.gmra.mrb[20].mxu1 %vm678_vm3, %v899_v11 }
 0x28d   : > { %1539 = vmatprep.mubr.msk.bf16.mxu1 %vm1688_vm1, %v1687_v18  ;;  %1538 = vmatpush3.bf16.msra.mxu1 %v1146_v15 }
 0x28e   : > { %1549 = vmatprep.subr.bf16.mxu1 %v1687_v18 }
 0x347   : > { %v944_v17 = vpop.f32.mrb[12].mxu0 }
 0x348   : > { %v1088_v19 = vpack.c.bf16 %v944_v17, %v944_v17  ;;  %v1511_v20 = vpop.f32.mrb[13].mxu0 }
 0x349   : > { %v947_v22 = vpop.f32.mrb[14].mxu0 }
 0x34a   : > { %v1512_v23 = vpop.f32.mrb[15].mxu0  ;;  %1534 = vmatmul.mubr.msk.bf16.vlgmr.msra.gmra.mrb[20].mxu0 %vm678_vm3, %v1088_v19 }
 0x34b   : > { %1544 = vmatpush3.bf16.msra.mxu0 %v1192_v21  ;;  %1545 = vmatprep.mubr.msk.bf16.mxu0 %vm1688_vm1, %v1687_v18 }
 0x34f   : > { %v990_v25 = vpop.f32.mrb[16].mxu1 }
 0x350   : > { %v1089_v26 = vpack.c.bf16 %v990_v25, %v990_v25  ;;  %v1517_v27 = vpop.f32.mrb[17].mxu1 }
 0x351   : > { %v993_v29 = vpop.f32.mrb[18].mxu1 }
 0x352   : > { %v1518_v30 = vpop.f32.mrb[19].mxu1  ;;  %1540 = vmatmul.mubr.msk.bf16.vlgmr.msra.gmra.mrb[24].mxu1 %vm678_vm3, %v1089_v26 }
 0x353   : > { %1550 = vmatpush3.bf16.msra.mxu1 %v1238_v28  ;;  %1551 = vmatprep.mubr.msk.bf16.mxu1 %vm1688_vm1, %v1687_v18 }
 0x357   : > { %v1036_v31 = vpop.f32.mrb[16].mxu0 }
 0x358   : > { %v1090_v32 = vpack.c.bf16 %v1036_v31, %v1036_v31  ;;  %v1523_v33 = vpop.f32.mrb[17].mxu0 }
 0x359   : > { %v1039_v34 = vpop.f32.mrb[18].mxu0 }
 0x35a   : > { %v1524_v35 = vpop.f32.mrb[19].mxu0  ;;  %1546 = vmatmul.mubr.msk.bf16.vlgmr.msra.gmra.mrb[24].mxu0 %vm678_vm3, %v1090_v32 }
 0x35f   : > { %v1082_v36 = vpop.f32.mrb[20].mxu1 }
 0x360   : > { %v1091_v37 = vpack.c.bf16 %v1082_v36, %v1082_v36  ;;  %v1529_v38 = vpop.f32.mrb[21].mxu1 }
 0x361   : > { %v1085_v40 = vpop.f32.mrb[22].mxu1 }
 0x362   : > { %v1530_v41 = vpop.f32.mrb[23].mxu1  ;;  %1552 = vmatmul.mubr.msk.bf16.vlgmr.msra.gmra.mrb[28].mxu1 %vm678_vm3, %v1091_v37 }
 0x41d   : > { %v1136_v43 = vpop.f32.mrb[20].mxu0 }
 0x41e   : > { %v1535_v44 = vpop.f32.mrb[21].mxu0  ;;  %v1280_v47 = vsel %vm431_vm0, %v1136_v43, 0.0 }
 0x41f   : > { %v1139_v45 = vpop.f32.mrb[22].mxu0 }
 0x420   : > { %v1536_v46 = vpop.f32.mrb[23].mxu0 }
 0x425   : > { %v1182_v18 = vpop.f32.mrb[24].mxu1 }
 0x426   : > { %v1281_v48 = vsel %vm431_vm0, %v1182_v18, 0.0  ;;  %v1541_v49 = vpop.f32.mrb[25].mxu1 }
 0x427   : > { %v1282_v50 = vadd.f32 %v1281_v48, %v1280_v47  ;;  %v1185_v51 = vpop.f32.mrb[26].mxu1 }
 0x428   : > { %v1542_v52 = vpop.f32.mrb[27].mxu1 }
 0x42d   : > { %v1228_v53 = vpop.f32.mrb[24].mxu0 }
 0x42e   : > { %v1283_v54 = vsel %vm431_vm0, %v1228_v53, 0.0  ;;  %v1547_v55 = vpop.f32.mrb[25].mxu0 }
 0x42f   : > { %v1284_v56 = vadd.f32 %v1283_v54, %v1282_v50  ;;  %v1231_v57 = vpop.f32.mrb[26].mxu0 }
 0x430   : > { %v1548_v58 = vpop.f32.mrb[27].mxu0 }
 0x435   : > { %v1274_v59 = vpop.f32.mrb[28].mxu1 }
 0x436   : > { %v1285_v60 = vsel %vm431_vm0, %v1274_v59, 0.0  ;;  %v1553_v61 = vpop.f32.mrb[29].mxu1 }
 0x437   : > { %v1286_v62 = vadd.f32 %v1285_v60, %v1284_v56  ;;  %v1277_v63 = vpop.f32.mrb[30].mxu1 }
 0x438   : > { %v1554_v0 = vpop.f32.mrb[31].mxu1 }
 0x439   : > { %v1294_v1 = vadd.f32 %v1431_v39, %v1286_v62 }
 0x43b   : > { %1295 = vst.msk [vmem:[%s299_s21] sm:$0xff] %vm431_vm0, %v1294_v1 }
 0x43c   : > { %1635 = shalt.err (!%p1632_p3)
}
 0x43d   : > { %s1636_s16 = scalar_lea.hbm %s1955_s29, 128  ;;  %s1640_s19 = scalar_lea.hbm %s2005_s7, 256 }
 0x43e   : > { %p1637_p4 = scmp.ne.s32.totalorder %s1955_s29, %s1636_s16  ;;  %p1641_p9 = scmp.lt.u32.totalorder %s1955_s29, %s2005_s7 }
 0x43f   : > { %p1642_p10 = scmp.lt.u32.totalorder %s1640_s19, %s1636_s16  ;;  %p1644_p12 = scmp.lt.u32.totalorder %s1636_s16, %s1955_s29 }
 0x440   : > { %p1638_p7 = pnand %p1637_p4, %p1768_p5 }
 0x441   : > { %p1643_p11 = por %p1642_p10, %p1641_p9 }
 0x442   : > { %p1639_p8 = pneg %p1638_p7 }
 0x443   : > { %p1645_p13 = por %p1644_p12, %p1643_p11 }
 0x445   : > { %p1646_p0 = pnand %p1645_p13, %p1639_p8 }
 0x447   : > { %1649 = shalt.err (!%p1646_p0)
}
 0x448   : > { %1556 = dma.vmem_to_hbm [thread:$0]  (%p1768_p5), %s1957_s15, 128, %s1955_s29, %s1297_s8  }
 0x449 PF: > { %p1562_p1 = scmp.ge.s32.totalorder %s1684_s27, 2  ;;  %s1322_s22 = sand.u32 1, %s1672_s24  }
 0x44a   : > { %s1323_s23 = scalar_lea.sflag [#allocation3], %s1322_s22 }
 0x44b   : > { %p1559_p2 = pnand %p1562_p1, %p1772_p6 }
 0x44d   : > { %1667 = dma.done.wait (!%p1559_p2), %s1323_s23, 128  }
 0x44e   : > { %1669 = vsyncadd (!%p1559_p2), %s1323_s23, 4294967168  ;;  %p17_p3 = scmp.ge.s32.totalorder %s1755_s30, 4   ;;  %s2008_s24 = smov %s1676_s25 }
 0x44f   : > { %s2009_s25 = smov %s1680_s26  ;;  %s2010_s26 = smov %s1766_s10 }
 0x450   : > { %s2011_s27 = smov %s1755_s30  ;;  %19 = sbr.rel (!%p17_p3) target bundleno = 3 (0x3), region = 89 }
 0x457   :  { %1328 = vsyncpa [#allocation3], 1 }
 0x458   :  { %1330 = vsyncpa [#allocation3 + $0x1], 1 }

</bundles_post_ra>
